<compile_context>
chip_gen: v7x
topology: tpu7x:2x2x1
jax: 0.10.0
libtpu: 0.0.40
codegen_flags: <defaults>
</compile_context>

<pallas_src>
import jax
import jax.numpy as jnp
from jax.experimental import pallas as pl
from jax.experimental.pallas import tpu as pltpu

_LANES = 128
_VMEM_BUDGET = 12 * 1024 * 1024   # bytes for 3 tiles x 2 pipeline buffers


def _cdiv(a, b):
    return -(-a // b)


def _round_up(a, b):
    return _cdiv(a, b) * b


# ------------------------------------------------------------------ kernels

def _gate_kernel_rowwise(x_ref, r_ref, w_ref, b_ref, o_ref):
    """One logical row per vreg row (H >= 128 or H does not divide 128)."""
    x = x_ref[...].astype(jnp.float32)              # (T, H)
    r = r_ref[...].astype(jnp.float32)
    wa = w_ref[0:1, :].astype(jnp.float32)          # (1, H) coeff on x
    wb = w_ref[1:2, :].astype(jnp.float32)          # (1, H) coeff on res
    logits = jnp.sum(x * wa + r * wb, axis=-1, keepdims=True) + b_ref[0]
    g = jax.nn.sigmoid(logits)                      # (T, 1), broadcasts over H
    o_ref[...] = (x * g + r * (1.0 - g)).astype(o_ref.dtype)


def _gate_kernel_packed(x_ref, r_ref, w_ref, bmat_ref, b_ref, o_ref):
    """k = 128 // H logical rows packed per vreg row (lane-dense, W = k*H)."""
    x = x_ref[...].astype(jnp.float32)              # (T, W)
    r = r_ref[...].astype(jnp.float32)
    wa = w_ref[0:1, :].astype(jnp.float32)          # (1, W) tiled coeff on x
    wb = w_ref[1:2, :].astype(jnp.float32)          # (1, W) tiled coeff on res
    prod = x * wa + r * wb                          # (T, W) f32
    # Block-diagonal ones matmul = segmented row-sum, already broadcast back
    # over each logical row's H lanes (MXU; avoids sub-128-lane reductions).
    logits = jnp.dot(prod, bmat_ref[...],
                     preferred_element_type=jnp.float32) + b_ref[0]
    g = jax.nn.sigmoid(logits)                      # (T, W)
    o_ref[...] = (x * g + r * (1.0 - g)).astype(o_ref.dtype)


def _add_kernel(x_ref, r_ref, o_ref):
    o_ref[...] = x_ref[...] + r_ref[...]


# ----------------------------------------------------------------- wrappers

def _tiled_add(x, res):
    """gate=False path: lane-dense, row-tiled elementwise add."""
    shape, dtype = x.shape, x.dtype
    n = x.size
    rows = _cdiv(n, _LANES)
    itemsize = jnp.dtype(dtype).itemsize
    t_max = max(8, min(2048, (_VMEM_BUDGET // (6 * _LANES * itemsize)) // 8 * 8))
    tile = min(t_max, _round_up(rows, 8))
    grid_n = _cdiv(rows, tile)
    padded_rows = grid_n * tile
    pad = padded_rows * _LANES - n
    xf = jnp.pad(x.reshape(-1), (0, pad)).reshape(padded_rows, _LANES)
    rf = jnp.pad(res.reshape(-1), (0, pad)).reshape(padded_rows, _LANES)
    out = pl.pallas_call(
        _add_kernel,
        out_shape=jax.ShapeDtypeStruct((padded_rows, _LANES), dtype),
        grid=(grid_n,),
        in_specs=[pl.BlockSpec((tile, _LANES), lambda i: (i, 0)),
                  pl.BlockSpec((tile, _LANES), lambda i: (i, 0))],
        out_specs=pl.BlockSpec((tile, _LANES), lambda i: (i, 0)),
        compiler_params=pltpu.CompilerParams(
            dimension_semantics=("parallel",)),
    )(xf, rf)
    return out.reshape(-1)[:n].reshape(shape)


def gate_residue(x, res, weight=None, bias=None, gate=True):
    """x, res: (..., H). weight: (3H,) or (1, 3H); bias: scalar (gate=True)."""
    if not gate:
        return _tiled_add(x, res)

    *lead, H = x.shape
    rows = 1
    for d in lead:
        rows *= d
    dtype = x.dtype

    # Fold the 3H->1 Linear: logit = x.(Wx+Wd) + res.(Wr-Wd) + b
    weight = jnp.asarray(weight).reshape(3 * H)
    wx, wr, wd = weight[:H], weight[H:2 * H], weight[2 * H:]
    wa = (wx + wd).astype(dtype)          # coefficient on x
    wb = (wr - wd).astype(dtype)          # coefficient on res

    # Lane-dense packing factor.
    if H < _LANES and _LANES % H == 0:
        k = _LANES // H
    else:
        k = 1
    W = k * H

    w2 = jnp.stack([jnp.tile(wa, k), jnp.tile(wb, k)], axis=0)    # (2, W)
    b2 = jnp.asarray(bias, dtype=jnp.float32).reshape(1)          # SMEM scalar

    # Tile rows so 3 arrays x 2 pipeline buffers fit the VMEM budget.
    itemsize = jnp.dtype(dtype).itemsize
    t_max = max(8, min(2048, (_VMEM_BUDGET // (6 * W * itemsize)) // 8 * 8))
    packed_rows = _cdiv(rows, k)
    tile = min(t_max, _round_up(packed_rows, 8))
    grid_n = _cdiv(packed_rows, tile)
    padded_packed = grid_n * tile
    padded_rows = padded_packed * k

    x2 = x.reshape(rows, H)
    r2 = res.reshape(rows, H)
    pad = padded_rows - rows
    if pad:
        x2 = jnp.pad(x2, ((0, pad), (0, 0)))
        r2 = jnp.pad(r2, ((0, pad), (0, 0)))
    xp = x2.reshape(padded_packed, W)
    rp = r2.reshape(padded_packed, W)

    row_spec = pl.BlockSpec((tile, W), lambda i: (i, 0))
    w_spec = pl.BlockSpec((2, W), lambda i: (0, 0))
    smem_spec = pl.BlockSpec(memory_space=pltpu.MemorySpace.SMEM)

    if k > 1:
        seg = jnp.arange(W) // H
        bmat = (seg[:, None] == seg[None, :]).astype(jnp.float32)  # (W, W)
        kernel = _gate_kernel_packed
        in_specs = [row_spec, row_spec, w_spec,
                    pl.BlockSpec((W, W), lambda i: (0, 0)), smem_spec]
        args = (xp, rp, w2, bmat, b2)
    else:
        kernel = _gate_kernel_rowwise
        in_specs = [row_spec, row_spec, w_spec, smem_spec]
        args = (xp, rp, w2, b2)

    out = pl.pallas_call(
        kernel,
        out_shape=jax.ShapeDtypeStruct((padded_packed, W), dtype),
        grid=(grid_n,),
        in_specs=in_specs,
        out_specs=row_spec,
        compiler_params=pltpu.CompilerParams(
            dimension_semantics=("parallel",)),
    )(*args)

    out = out.reshape(padded_rows, H)[:rows]
    return out.reshape(*lead, H)


# ---------------------------------------------------------------- reference

def _reference(x, res, weight, bias, gate=True):
    if not gate:
        return x + res
    cat = jnp.concatenate([x, res, x - res], axis=-1)
    g = jax.nn.sigmoid(cat @ jnp.asarray(weight).reshape(-1, 1) + bias)
    return x * g + res * (1.0 - g)


if __name__ == "__main__":
    B, S, H = 2, 8, 32
    key = jax.random.PRNGKey(0)
    kx, kr, kw, kb = jax.random.split(key, 4)

    x = jax.random.normal(kx, (B, S, H), dtype=jnp.float32)
    res = jax.random.normal(kr, (B, S, H), dtype=jnp.float32)

    # Deterministic "Linear(hidden*3, 1)" parameters (torch-style uniform init).
    bound = 1.0 / jnp.sqrt(3.0 * H)
    weight = jax.random.uniform(kw, (3 * H,), minval=-bound, maxval=bound,
                                dtype=jnp.float32)
    bias = jax.random.uniform(kb, (), minval=-bound, maxval=bound,
                              dtype=jnp.float32)

    # Gated path (lane-dense packed kernel since H=32 < 128).
    out_gated = gate_residue(x, res, weight, bias, gate=True)
    jax.block_until_ready(out_gated)
    ref_gated = _reference(x, res, weight, bias, gate=True)

    # Ungated path (tiled elementwise add kernel).
    out_plain = gate_residue(x, res, gate=False)
    jax.block_until_ready(out_plain)
    ref_plain = _reference(x, res, weight, bias, gate=False)

    assert out_gated.shape == (B, S, H)
    assert jnp.allclose(out_gated, ref_gated, atol=1e-5, rtol=1e-5)
    assert jnp.allclose(out_plain, ref_plain, atol=1e-6, rtol=1e-6)
    print("KERNEL_OK")
</pallas_src>

<mosaic_0001>
module attributes {stable_mosaic.version = 11 : i64} {
  func.func @_gate_kernel_packed(%arg0: i32, %arg1: memref<8x128xf32, #tpu.memory_space<vmem>>, %arg2: memref<8x128xf32, #tpu.memory_space<vmem>>, %arg3: memref<2x128xf32, #tpu.memory_space<vmem>>, %arg4: memref<128x128xf32, #tpu.memory_space<vmem>>, %arg5: memref<1xf32, #tpu.memory_space<smem>>, %arg6: memref<8x128xf32, #tpu.memory_space<vmem>>) attributes {dimension_semantics = [#tpu.dimension_semantics<parallel>], iteration_bounds = array<i64: 1>, scalar_prefetch = 0 : i64, scratch_operands = 0 : i64, tpu.core_type = #tpu.core_type<tc>, window_params = [{transform_indices = @transform_0, window_bounds = array<i64: 8, 128>}, {transform_indices = @transform_1, window_bounds = array<i64: 8, 128>}, {pipeline_mode = #tpu.pipeline_mode<synchronous>, transform_indices = @transform_2, window_bounds = array<i64: 2, 128>}, {pipeline_mode = #tpu.pipeline_mode<synchronous>, transform_indices = @transform_3, window_bounds = array<i64: 128, 128>}, {transform_indices = @transform_4, window_bounds = array<i64: 1>}, {transform_indices = @transform_5, window_bounds = array<i64: 8, 128>}]} {
    %c0 = arith.constant 0 : index
    %c0_0 = arith.constant 0 : index
    %0 = vector.load %arg1[%c0, %c0_0] : memref<8x128xf32, #tpu.memory_space<vmem>>, vector<8x128xf32>
    %c0_1 = arith.constant 0 : index
    %c0_2 = arith.constant 0 : index
    %1 = vector.load %arg2[%c0_1, %c0_2] : memref<8x128xf32, #tpu.memory_space<vmem>>, vector<8x128xf32>
    %c0_3 = arith.constant 0 : index
    %c0_4 = arith.constant 0 : index
    %2 = vector.load %arg3[%c0_3, %c0_4] : memref<2x128xf32, #tpu.memory_space<vmem>>, vector<1x128xf32>
    %c1 = arith.constant 1 : index
    %c0_5 = arith.constant 0 : index
    %3 = vector.load %arg3[%c1, %c0_5] : memref<2x128xf32, #tpu.memory_space<vmem>>, vector<1x128xf32>
    %4 = vector.broadcast %2 : vector<1x128xf32> to vector<8x128xf32>
    %5 = arith.mulf %0, %4 : vector<8x128xf32>
    %6 = vector.broadcast %3 : vector<1x128xf32> to vector<8x128xf32>
    %7 = arith.mulf %1, %6 : vector<8x128xf32>
    %8 = arith.addf %5, %7 : vector<8x128xf32>
    %c0_6 = arith.constant 0 : index
    %c0_7 = arith.constant 0 : index
    %9 = vector.load %arg4[%c0_6, %c0_7] : memref<128x128xf32, #tpu.memory_space<vmem>>, vector<128x128xf32>
    %cst = arith.constant dense<0.000000e+00> : vector<8x128xf32>
    %10 = tpu.matmul %8, %9, %cst {dimension_numbers = #tpu.dot_dimension_numbers<[1], [0], [0], [1], [0, 0, 1, 1], [], []>} : vector<8x128xf32>, vector<128x128xf32>, vector<8x128xf32> -> vector<8x128xf32>
    %c0_8 = arith.constant 0 : index
    %11 = memref.load %arg5[%c0_8] : memref<1xf32, #tpu.memory_space<smem>>
    %12 = vector.broadcast %11 : f32 to vector<8x128xf32>
    %13 = arith.addf %10, %12 : vector<8x128xf32>
    %14 = arith.negf %13 : vector<8x128xf32>
    %15 = math.exp %14 : vector<8x128xf32>
    %cst_9 = arith.constant 1.000000e+00 : f32
    %16 = vector.broadcast %cst_9 : f32 to vector<8x128xf32>
    %17 = arith.addf %16, %15 : vector<8x128xf32>
    %18 = arith.divf %16, %17 : vector<8x128xf32>
    %19 = arith.mulf %0, %18 : vector<8x128xf32>
    %cst_10 = arith.constant 1.000000e+00 : f32
    %20 = vector.broadcast %cst_10 : f32 to vector<8x128xf32>
    %21 = arith.subf %20, %18 : vector<8x128xf32>
    %22 = arith.mulf %1, %21 : vector<8x128xf32>
    %23 = arith.addf %19, %22 : vector<8x128xf32>
    %c0_11 = arith.constant 0 : index
    %c0_12 = arith.constant 0 : index
    %24 = vector.load %arg6[%c0_11, %c0_12] : memref<8x128xf32, #tpu.memory_space<vmem>>, vector<8x128xf32>
    tpu.vector_store %arg6[%c0_11, %c0_12], %23 {strides = array<i32>} : memref<8x128xf32, #tpu.memory_space<vmem>>, vector<8x128xf32>,
    return
  }
  func.func @transform_0(%arg0: i32) -> (i32, i32) {
    %c0_i32 = arith.constant 0 : i32
    %c0_i32_0 = arith.constant 0 : i32
    return %arg0, %c0_i32 : i32, i32
  }
  func.func @transform_1(%arg0: i32) -> (i32, i32) {
    %c0_i32 = arith.constant 0 : i32
    %c0_i32_0 = arith.constant 0 : i32
    return %arg0, %c0_i32 : i32, i32
  }
  func.func @transform_2(%arg0: i32) -> (i32, i32) {
    %c0_i32 = arith.constant 0 : i32
    %c0_i32_0 = arith.constant 0 : i32
    %c0_i32_1 = arith.constant 0 : i32
    return %c0_i32, %c0_i32_0 : i32, i32
  }
  func.func @transform_3(%arg0: i32) -> (i32, i32) {
    %c0_i32 = arith.constant 0 : i32
    %c0_i32_0 = arith.constant 0 : i32
    %c0_i32_1 = arith.constant 0 : i32
    return %c0_i32, %c0_i32_0 : i32, i32
  }
  func.func @transform_4(%arg0: i32) -> i32 {
    %c0_i32 = arith.constant 0 : i32
    %c0_i32_0 = arith.constant 0 : i32
    return %c0_i32 : i32
  }
  func.func @transform_5(%arg0: i32) -> (i32, i32) {
    %c0_i32 = arith.constant 0 : i32
    %c0_i32_0 = arith.constant 0 : i32
    return %arg0, %c0_i32 : i32, i32
  }
}

</mosaic_0001>

<bundles_post_ra>
// kernel: tpu_custom_call.1
= control target key start
LH: loop header
LB: loop body
LE: loop exit
PB: predicated region body
PF: predicated region fallthrough
CT: control target
= control target key end

     0   :  { %11 = vsyncpa [#allocation4], 0  ;;  %s471_s0 = inlined_call_operand.hbm [shape: f32[8,128], index: 0, kind: input, shape index: {}]   ;;  %s472_s1 = inlined_call_operand.hbm [shape: f32[8,128], index: 1, kind: input, shape index: {}]   ;;  %s473_s2 = inlined_call_operand.vmem [shape: f32[2,128], index: 2, kind: input, shape index: {}]   ;;  %s474_s3 = inlined_call_operand.hbm [shape: f32[128,128], index: 3, kind: input, shape index: {}]   ;;  %s475_s4 = inlined_call_operand.<no memory space> [shape: f32[1], index: 4, kind: input, shape index: {}]   ;;  %s476_s5 = inlined_call_operand.hbm [shape: f32[8,128], index: 5, kind: output, shape index: {}]  }
   0x1   :  { %12 = vsyncpa [#allocation7], 0 }
   0x2   :  { %13 = vsyncpa [#allocation5], 0  ;;  %s375_s18 = smov [#allocation6]   ;;  %s376_s20 = smov [#allocation3]  }
   0x3   :  { %s30_s19 = sshll.u32 %s375_s18, 4  ;;  %s20_s21 = sshll.u32 %s376_s20, 4  ;;  %s31_s19 = int_to_ptr.vmem [resolvable:$true] %s30_s19  ;;  %s21_s21 = int_to_ptr.vmem [resolvable:$true] %s20_s21 }
   0x4   :  { %s281_s24 = scalar_lea.hbm %s472_s1, 128 }
   0x5   :  { %p282_p0 = scmp.ne.s32.totalorder %s472_s1, %s281_s24  ;;  %p285_p1 = scmp.lt.u32.totalorder %s281_s24, %s472_s1 }
   0x7   :  { %p287_p2 = pnand %p285_p1, %p282_p0 }
   0x9   :  { %290 = shalt.err (!%p287_p2)
}
   0xa   :  { %s291_s29 = scalar_lea.vmem %s31_s19, 128  ;;  %p296_p4 = scmp.lt.s32.totalorder %s31_s19, %s31_s19 }
   0xb   :  { %p292_p3 = scmp.ne.s32.totalorder %s31_s19, %s291_s29  ;;  %p297_p5 = scmp.lt.s32.totalorder %s291_s29, %s291_s29 }
   0xd   :  { %p298_p6 = por %p297_p5, %p296_p4 }
   0xf   :  { %p299_p7 = pnand %p298_p6, %p292_p3 }
  0x11   :  { %302 = shalt.err (!%p299_p7)
}
  0x12   :  { %33 = dma.hbm_to_vmem [thread:$0]  %s472_s1, 128, %s31_s19, [#allocation7]  }
  0x13   :  { %s303_s9 = scalar_lea.hbm %s471_s0, 128 }
  0x14   :  { %p304_p8 = scmp.ne.s32.totalorder %s471_s0, %s303_s9  ;;  %p307_p9 = scmp.lt.u32.totalorder %s303_s9, %s471_s0 }
  0x16   :  { %p309_p10 = pnand %p307_p9, %p304_p8 }
  0x18   :  { %312 = shalt.err (!%p309_p10)
}
  0x19   :  { %s313_s14 = scalar_lea.vmem %s21_s21, 128  ;;  %p318_p12 = scmp.lt.s32.totalorder %s21_s21, %s21_s21 }
  0x1a   :  { %p314_p11 = scmp.ne.s32.totalorder %s21_s21, %s313_s14  ;;  %p319_p13 = scmp.lt.s32.totalorder %s313_s14, %s313_s14 }
  0x1c   :  { %p320_p0 = por %p319_p13, %p318_p12 }
  0x1e   :  { %p321_p1 = pnand %p320_p0, %p314_p11 }
  0x20   :  { %324 = shalt.err (!%p321_p1)
}
  0x21   :  { %23 = dma.hbm_to_vmem [thread:$0]  %s471_s0, 128, %s21_s21, [#allocation4]  }
  0x22   :  { %s377_s16 = smov [#allocation8]   ;;  %s325_s20 = scalar_lea.hbm %s474_s3, 2048 }
  0x23   :  { %s41_s17 = sshll.u32 %s377_s16, 4  ;;  %p326_p2 = scmp.ne.s32.totalorder %s474_s3, %s325_s20  ;;  %s42_s17 = int_to_ptr.vmem [resolvable:$true] %s41_s17 }
  0x24   :  { %p329_p3 = scmp.lt.u32.totalorder %s325_s20, %s474_s3 }
  0x26   :  { %p331_p4 = pnand %p329_p3, %p326_p2 }
  0x28   :  { %334 = shalt.err (!%p331_p4)
}
  0x29   :  { %s335_s26 = scalar_lea.vmem %s42_s17, 2048  ;;  %p340_p6 = scmp.lt.s32.totalorder %s42_s17, %s42_s17 }
  0x2a   :  { %p336_p5 = scmp.ne.s32.totalorder %s42_s17, %s335_s26  ;;  %p341_p7 = scmp.lt.s32.totalorder %s335_s26, %s335_s26 }
  0x2c   :  { %p342_p8 = por %p341_p7, %p340_p6 }
  0x2e   :  { %p343_p9 = pnand %p342_p8, %p336_p5 }
  0x30   :  { %346 = shalt.err (!%p343_p9)
}
  0x31   :  { %s378_s0 = smov 128   ;;  %s379_s21 = smov 8  }
  0x32   :  { %47 = dma.hbm_to_vmem [thread:$0]  %s474_s3, 2048, %s42_s17, [#allocation7], %s378_s0, %s378_s0, %s379_s21  }
  0x33   :  { %369 = dma.done.wait [#allocation4], 128  }
  0x34   :  { %370 = vsyncadd [#allocation4], 4294967168 }
  0x35   :  { %371 = dma.done.wait [#allocation7], 2176  }
  0x36   :  { %372 = vsyncadd [#allocation7], 4294965120  ;;  %v380_v0 = vmov 0.0|0.0   ;;  %vm381_vm0 = vmmov 0   ;;  %v382_v1 = vmov 0.0   ;;  %v74_v2 = vld [vmem:[#allocation8] sm:$0xff]  ;;  %v91_v33 = vstv %s475_s4 }
  0x37   :  { %244 = vmatprep.subr.bf16.mxu0 %v380_v0  ;;  %241 = vmatprep.mubr.msk.f32.mxu0 %vm381_vm0, %v382_v1  ;;  %v75_v3 = vld [vmem:[#allocation8 + $0x8] sm:$0xff]  ;;  %v76_v4 = vld [vmem:[#allocation8 + $0x10] sm:$0xff]  ;;  %v77_v6 = vld [vmem:[#allocation8 + $0x18] sm:$0xff] }
  0x38   :  { %v245_v5 = vpack.c.bf16 %v75_v3, %v74_v2  ;;  %v248_v7 = vpack.c.bf16 %v77_v6, %v76_v4  ;;  %v78_v8 = vld [vmem:[#allocation8 + $0x20] sm:$0xff]  ;;  %v79_v9 = vld [vmem:[#allocation8 + $0x28] sm:$0xff]  ;;  %v80_v11 = vld [vmem:[#allocation8 + $0x30] sm:$0xff] }
  0x39   :  { %v251_v10 = vpack.c.bf16 %v79_v9, %v78_v8  ;;  %v81_v12 = vld [vmem:[#allocation8 + $0x38] sm:$0xff]  ;;  %v82_v14 = vld [vmem:[#allocation8 + $0x40] sm:$0xff]  ;;  %v83_v15 = vld [vmem:[#allocation8 + $0x48] sm:$0xff] }
  0x3a   :  { %246 = vmatpush3.bf16.msra.mxu0 %v245_v5  ;;  %v254_v13 = vpack.c.bf16 %v81_v12, %v80_v11  ;;  %v257_v16 = vpack.c.bf16 %v83_v15, %v82_v14  ;;  %v84_v17 = vld [vmem:[#allocation8 + $0x50] sm:$0xff]  ;;  %v85_v18 = vld [vmem:[#allocation8 + $0x58] sm:$0xff]  ;;  %v86_v20 = vld [vmem:[#allocation8 + $0x60] sm:$0xff] }
  0x3b   :  { %247 = vmatprep.subr.bf16.mxu0 %v380_v0  ;;  %v260_v19 = vpack.c.bf16 %v85_v18, %v84_v17  ;;  %v87_v21 = vld [vmem:[#allocation8 + $0x68] sm:$0xff]  ;;  %v59_v22 = vld [vmem:[#allocation3] sm:$0xff]  ;;  %v60_v24 = vld [vmem:[#allocation6] sm:$0xff] }
  0x3c   :  { %v263_v23 = vpack.c.bf16 %v87_v21, %v86_v20  ;;  %v189_v25 = vld [vmem:[%s473_s2] ss:$0 sm:$0xff]  ;;  %v190_v26 = vld [vmem:[%s473_s2 + $0x1] ss:$0 sm:$0xff]  ;;  %v89_v28 = vld [vmem:[#allocation8 + $0x78] sm:$0xff]  ;;  %s383_s2 = smov [#allocation9]  }
  0x3d   :  { %v88_v27 = vld [vmem:[#allocation8 + $0x70] sm:$0xff]  ;;  %v67_v29 = vmul.f32 %v189_v25, %v59_v22  ;;  %v72_v30 = vmul.f32 %v190_v26, %v60_v24  ;;  %s179_s9 = sshll.u32 %s383_s2, 4  ;;  %s180_s9 = int_to_ptr.vmem [resolvable:$true] %s179_s9 }
  0x3e   :  { %249 = vmatpush3.bf16.msra.mxu0 %v248_v7  ;;  %v266_v31 = vpack.c.bf16 %v89_v28, %v88_v27  ;;  %s347_s10 = scalar_lea.vmem %s180_s9, 128  ;;  %p352_p11 = scmp.lt.s32.totalorder %s180_s9, %s180_s9 }
  0x3f   :  { %250 = vmatprep.subr.bf16.mxu0 %v380_v0  ;;  %v73_v32 = vadd.f32 %v72_v30, %v67_v29  ;;  %p348_p10 = scmp.ne.s32.totalorder %s180_s9, %s347_s10  ;;  %p353_p12 = scmp.lt.s32.totalorder %s347_s10, %s347_s10 }
  0x41   :  { %p354_p13 = por %p353_p12, %p352_p11 }
  0x42   :  { %252 = vmatpush3.bf16.msra.mxu0 %v251_v10 }
  0x43   :  { %253 = vmatprep.subr.bf16.mxu0 %v380_v0  ;;  %p355_p0 = pnand %p354_p13, %p348_p10 }
  0x46   :  { %255 = vmatpush3.bf16.msra.mxu0 %v254_v13 }
  0x47   :  { %256 = vmatprep.subr.bf16.mxu0 %v380_v0 }
  0x4a   :  { %258 = vmatpush3.bf16.msra.mxu0 %v257_v16 }
  0x4b   :  { %259 = vmatprep.subr.bf16.mxu0 %v380_v0 }
  0x4e   :  { %261 = vmatpush3.bf16.msra.mxu0 %v260_v19 }
  0x4f   :  { %262 = vmatprep.subr.bf16.mxu0 %v380_v0 }
  0x52   :  { %264 = vmatpush3.bf16.msra.mxu0 %v263_v23 }
  0x53   :  { %265 = vmatprep.subr.bf16.mxu0 %v380_v0 }
  0x56   :  { %267 = vmatpush3.bf16.msra.mxu0 %v266_v31 }
  0x59   :  { %242 = vmatmul.mubr.f32.vlgmr.msra.gmra.mrb[0].mxu0 %v73_v32 }
 0x12c   :  { %v158_v34 = vpop.f32.mrb[0].mxu0 }
 0x12d   :  { %v159_v35 = vadd.f32 %v158_v34, %v91_v33  ;;  %v243_v36 = vpop.f32.mrb[1].mxu0 }
 0x12f   :  { %v191_v37 = vmul.f32 -1.442695, %v159_v35 }
 0x131   :  { %277 = vpow2.f32 %v191_v37 }
 0x13b   :  { %v278_v38 = vpop.eup %277 }
 0x13c   :  { %v165_v39 = vadd.f32 1.0, %v278_v38 }
 0x13e   :  { %279 = vrcp.f32 %v165_v39 }
 0x148   :  { %v280_v40 = vpop.eup %279 }
 0x149   :  { %v169_v41 = vsub.f32 1.0, %v280_v40  ;;  %v168_v42 = vmul.f32 %v280_v40, %v59_v22 }
 0x14b   :  { %v170_v43 = vmul.f32 %v169_v41, %v60_v24 }
 0x14d   :  { %v171_v44 = vadd.f32 %v170_v43, %v168_v42 }
 0x14f   :  { %172 = vst [vmem:[#allocation9] sm:$0xff] %v171_v44 }
 0x150   :  { %358 = shalt.err (!%p355_p0)
}
 0x151   :  { %s359_s12 = scalar_lea.hbm %s476_s5, 128 }
 0x152   :  { %p360_p1 = scmp.ne.s32.totalorder %s476_s5, %s359_s12  ;;  %p363_p2 = scmp.lt.u32.totalorder %s359_s12, %s476_s5 }
 0x154   :  { %p365_p3 = pnand %p363_p2, %p360_p1 }
 0x156   :  { %368 = shalt.err (!%p365_p3)
}
 0x157   :  { %182 = dma.vmem_to_hbm [thread:$0]  %s180_s9, 128, %s476_s5, [#allocation5]  }
 0x158   :  { %373 = dma.done.wait [#allocation5], 128  }
 0x159   :  { %374 = vsyncadd [#allocation5], 4294967168 }
 0x15a   :  { %186 = vsyncpa [#allocation4], 1 }
 0x15b   :  { %187 = vsyncpa [#allocation7], 1 }
 0x15c   :  { %188 = vsyncpa [#allocation5], 1 }

</bundles_post_ra>
